<compile_context>
chip_gen: v6e
topology: v6e:2x2x1
jax: 0.10.0
libtpu: 0.0.40
codegen_flags: <defaults>
</compile_context>

<pallas_src>
import jax
import jax.numpy as jnp
from jax.experimental import pallas as pl
from jax.experimental.pallas import tpu as pltpu

HIDDEN = 20
LANES = 128

# Tiling policy knobs (rows of the lane-dense (rows, 128) slab).
MIN_ROW_TILE = 512    # keep per-step VALU work >> ~0.35 us grid-step overhead
MAX_ROW_TILE = 2048   # 2 MiB in + 2 MiB out per step; x2 buffering fits VMEM everywhere
TARGET_GRID = 4       # >=2 keeps both v7x TCs busy; >=3-4 lets DMA pipeline with compute


def _round_up(n, m):
    return -(-n // m) * m


def mlp_kernel(w_ref, x_ref, o_ref):
    """Fused Linear(1,20) -> ReLU -> Linear(20,1) on one (row_tile, 128) block.

    w_ref : SMEM f32[61]  layout: [w1(0:20), b1(20:40), w2(40:60), b2(60)]
    x_ref : VMEM (row_tile, 128) f32   -- batch packed lane-dense
    o_ref : VMEM (row_tile, 128) f32
    """
    # Pre-stage every SMEM scalar into locals BEFORE any vector math so the
    # splats are hoisted once per grid step (not re-issued per vreg tile).
    w1 = [w_ref[j] for j in range(HIDDEN)]
    b1 = [w_ref[HIDDEN + j] for j in range(HIDDEN)]
    w2 = [w_ref[2 * HIDDEN + j] for j in range(HIDDEN)]
    b2 = w_ref[3 * HIDDEN]

    x = x_ref[...]

    # 4 partial accumulators break the 20-deep dependent add chain (VALU ILP);
    # acc0 starts at the broadcast output bias so no final "+ b2" pass.
    acc0 = jnp.full_like(x, b2)
    acc1 = jnp.zeros_like(x)
    acc2 = jnp.zeros_like(x)
    acc3 = jnp.zeros_like(x)
    accs = [acc0, acc1, acc2, acc3]

    # Unrolled over the 20 hidden units: pure VPU scalar-broadcast mul/add,
    # max, mul, add -- no MXU push/pop, no cross-lane movement.
    for j in range(HIDDEN):
        h = jnp.maximum(x * w1[j] + b1[j], 0.0)
        accs[j % 4] = accs[j % 4] + h * w2[j]

    o_ref[...] = (accs[0] + accs[1]) + (accs[2] + accs[3])


def _tiling(batch):
    """Lane-dense tiling: returns (rows, row_tile, grid)."""
    rows_needed = max(1, -(-batch // LANES))
    rows8 = _round_up(rows_needed, 8)           # satisfy the (8, 128) constraint
    tile = _round_up(-(-rows8 // TARGET_GRID), 8)
    tile = max(MIN_ROW_TILE, min(MAX_ROW_TILE, tile))
    row_tile = min(tile, rows8)                 # never exceed the data (rows8 % 8 == 0)
    rows = _round_up(rows8, row_tile)
    return rows, row_tile, rows // row_tile


def pack_weights(w1, b1, w2, b2):
    """Single small SMEM slab: [w1(20), b1(20), w2(20), b2(1)].

    Hoist this out of the per-call path when the weights are static.
    """
    return jnp.concatenate([
        jnp.ravel(w1).astype(jnp.float32),
        jnp.ravel(b1).astype(jnp.float32),
        jnp.ravel(w2).astype(jnp.float32),
        jnp.ravel(b2).astype(jnp.float32),
    ])


def nn_forward(x, w1, b1, w2, b2):
    """x: (B, 1) f32.  w1: (20, 1), b1: (20,), w2: (1, 20), b2: (1,) (PyTorch layout)."""
    B = x.shape[0]
    rows, row_tile, grid = _tiling(B)
    b_pad = rows * LANES

    # Lane-dense packing of the batch.  For very large B, produce x in this
    # (rows, 128) layout upstream to avoid the extra HBM pad/reshape pass.
    x_flat = jnp.pad(jnp.ravel(x).astype(jnp.float32), (0, b_pad - B))
    x2d = x_flat.reshape(rows, LANES)

    w_packed = pack_weights(w1, b1, w2, b2)

    y2d = pl.pallas_call(
        mlp_kernel,
        out_shape=jax.ShapeDtypeStruct((rows, LANES), jnp.float32),
        grid=(grid,),
        in_specs=[
            pl.BlockSpec(memory_space=pltpu.MemorySpace.SMEM),   # packed weights
            pl.BlockSpec((row_tile, LANES), lambda i: (i, 0)),   # x (lane-dense)
        ],
        out_specs=pl.BlockSpec((row_tile, LANES), lambda i: (i, 0)),
        compiler_params=pltpu.CompilerParams(
            dimension_semantics=("parallel",)),
    )(w_packed, x2d)

    # Padded lanes hold relu(b1_j)*w2_j + b2 garbage; always slice to B.
    return y2d.reshape(-1)[:B].reshape(B, 1)


def reference_forward(x, w1, b1, w2, b2):
    """Pure-JAX reference matching the PyTorch module."""
    h = jnp.maximum(x @ w1.T + b1, 0.0)
    return h @ w2.T + b2


if __name__ == "__main__":
    key = jax.random.PRNGKey(0)
    kx, k1, k2, k3, k4 = jax.random.split(key, 5)

    B = 256  # small batch; input feature dim is 1 as in the PyTorch module
    x = jax.random.normal(kx, (B, 1), jnp.float32)

    # PyTorch nn.Linear-style init: U(-1/sqrt(fan_in), 1/sqrt(fan_in)).
    w1 = jax.random.uniform(k1, (HIDDEN, 1), jnp.float32, minval=-1.0, maxval=1.0)
    b1 = jax.random.uniform(k2, (HIDDEN,), jnp.float32, minval=-1.0, maxval=1.0)
    bound2 = 1.0 / float(jnp.sqrt(float(HIDDEN)))
    w2 = jax.random.uniform(k3, (1, HIDDEN), jnp.float32, minval=-bound2, maxval=bound2)
    b2 = jax.random.uniform(k4, (1,), jnp.float32, minval=-bound2, maxval=bound2)

    y = nn_forward(x, w1, b1, w2, b2)
    jax.block_until_ready(y)

    y_ref = reference_forward(x, w1, b1, w2, b2)
    assert y.shape == (B, 1)
    assert jnp.allclose(y, y_ref, atol=1e-5, rtol=1e-5)

    print("KERNEL_OK")
</pallas_src>

<mosaic_0001>
module attributes {stable_mosaic.version = 11 : i64} {
  func.func @mlp_kernel(%arg0: i32, %arg1: memref<61xf32, #tpu.memory_space<smem>>, %arg2: memref<8x128xf32, #tpu.memory_space<vmem>>, %arg3: memref<8x128xf32, #tpu.memory_space<vmem>>) attributes {dimension_semantics = [#tpu.dimension_semantics<parallel>], iteration_bounds = array<i64: 1>, scalar_prefetch = 0 : i64, scratch_operands = 0 : i64, tpu.core_type = #tpu.core_type<tc>, window_params = [{transform_indices = @transform_0, window_bounds = array<i64: 61>}, {transform_indices = @transform_1, window_bounds = array<i64: 8, 128>}, {transform_indices = @transform_2, window_bounds = array<i64: 8, 128>}]} {
    %c0 = arith.constant 0 : index
    %0 = memref.load %arg1[%c0] : memref<61xf32, #tpu.memory_space<smem>>
    %c1 = arith.constant 1 : index
    %1 = memref.load %arg1[%c1] : memref<61xf32, #tpu.memory_space<smem>>
    %c2 = arith.constant 2 : index
    %2 = memref.load %arg1[%c2] : memref<61xf32, #tpu.memory_space<smem>>
    %c3 = arith.constant 3 : index
    %3 = memref.load %arg1[%c3] : memref<61xf32, #tpu.memory_space<smem>>
    %c4 = arith.constant 4 : index
    %4 = memref.load %arg1[%c4] : memref<61xf32, #tpu.memory_space<smem>>
    %c5 = arith.constant 5 : index
    %5 = memref.load %arg1[%c5] : memref<61xf32, #tpu.memory_space<smem>>
    %c6 = arith.constant 6 : index
    %6 = memref.load %arg1[%c6] : memref<61xf32, #tpu.memory_space<smem>>
    %c7 = arith.constant 7 : index
    %7 = memref.load %arg1[%c7] : memref<61xf32, #tpu.memory_space<smem>>
    %c8 = arith.constant 8 : index
    %8 = memref.load %arg1[%c8] : memref<61xf32, #tpu.memory_space<smem>>
    %c9 = arith.constant 9 : index
    %9 = memref.load %arg1[%c9] : memref<61xf32, #tpu.memory_space<smem>>
    %c10 = arith.constant 10 : index
    %10 = memref.load %arg1[%c10] : memref<61xf32, #tpu.memory_space<smem>>
    %c11 = arith.constant 11 : index
    %11 = memref.load %arg1[%c11] : memref<61xf32, #tpu.memory_space<smem>>
    %c12 = arith.constant 12 : index
    %12 = memref.load %arg1[%c12] : memref<61xf32, #tpu.memory_space<smem>>
    %c13 = arith.constant 13 : index
    %13 = memref.load %arg1[%c13] : memref<61xf32, #tpu.memory_space<smem>>
    %c14 = arith.constant 14 : index
    %14 = memref.load %arg1[%c14] : memref<61xf32, #tpu.memory_space<smem>>
    %c15 = arith.constant 15 : index
    %15 = memref.load %arg1[%c15] : memref<61xf32, #tpu.memory_space<smem>>
    %c16 = arith.constant 16 : index
    %16 = memref.load %arg1[%c16] : memref<61xf32, #tpu.memory_space<smem>>
    %c17 = arith.constant 17 : index
    %17 = memref.load %arg1[%c17] : memref<61xf32, #tpu.memory_space<smem>>
    %c18 = arith.constant 18 : index
    %18 = memref.load %arg1[%c18] : memref<61xf32, #tpu.memory_space<smem>>
    %c19 = arith.constant 19 : index
    %19 = memref.load %arg1[%c19] : memref<61xf32, #tpu.memory_space<smem>>
    %c20 = arith.constant 20 : index
    %20 = memref.load %arg1[%c20] : memref<61xf32, #tpu.memory_space<smem>>
    %c21 = arith.constant 21 : index
    %21 = memref.load %arg1[%c21] : memref<61xf32, #tpu.memory_space<smem>>
    %c22 = arith.constant 22 : index
    %22 = memref.load %arg1[%c22] : memref<61xf32, #tpu.memory_space<smem>>
    %c23 = arith.constant 23 : index
    %23 = memref.load %arg1[%c23] : memref<61xf32, #tpu.memory_space<smem>>
    %c24 = arith.constant 24 : index
    %24 = memref.load %arg1[%c24] : memref<61xf32, #tpu.memory_space<smem>>
    %c25 = arith.constant 25 : index
    %25 = memref.load %arg1[%c25] : memref<61xf32, #tpu.memory_space<smem>>
    %c26 = arith.constant 26 : index
    %26 = memref.load %arg1[%c26] : memref<61xf32, #tpu.memory_space<smem>>
    %c27 = arith.constant 27 : index
    %27 = memref.load %arg1[%c27] : memref<61xf32, #tpu.memory_space<smem>>
    %c28 = arith.constant 28 : index
    %28 = memref.load %arg1[%c28] : memref<61xf32, #tpu.memory_space<smem>>
    %c29 = arith.constant 29 : index
    %29 = memref.load %arg1[%c29] : memref<61xf32, #tpu.memory_space<smem>>
    %c30 = arith.constant 30 : index
    %30 = memref.load %arg1[%c30] : memref<61xf32, #tpu.memory_space<smem>>
    %c31 = arith.constant 31 : index
    %31 = memref.load %arg1[%c31] : memref<61xf32, #tpu.memory_space<smem>>
    %c32 = arith.constant 32 : index
    %32 = memref.load %arg1[%c32] : memref<61xf32, #tpu.memory_space<smem>>
    %c33 = arith.constant 33 : index
    %33 = memref.load %arg1[%c33] : memref<61xf32, #tpu.memory_space<smem>>
    %c34 = arith.constant 34 : index
    %34 = memref.load %arg1[%c34] : memref<61xf32, #tpu.memory_space<smem>>
    %c35 = arith.constant 35 : index
    %35 = memref.load %arg1[%c35] : memref<61xf32, #tpu.memory_space<smem>>
    %c36 = arith.constant 36 : index
    %36 = memref.load %arg1[%c36] : memref<61xf32, #tpu.memory_space<smem>>
    %c37 = arith.constant 37 : index
    %37 = memref.load %arg1[%c37] : memref<61xf32, #tpu.memory_space<smem>>
    %c38 = arith.constant 38 : index
    %38 = memref.load %arg1[%c38] : memref<61xf32, #tpu.memory_space<smem>>
    %c39 = arith.constant 39 : index
    %39 = memref.load %arg1[%c39] : memref<61xf32, #tpu.memory_space<smem>>
    %c40 = arith.constant 40 : index
    %40 = memref.load %arg1[%c40] : memref<61xf32, #tpu.memory_space<smem>>
    %c41 = arith.constant 41 : index
    %41 = memref.load %arg1[%c41] : memref<61xf32, #tpu.memory_space<smem>>
    %c42 = arith.constant 42 : index
    %42 = memref.load %arg1[%c42] : memref<61xf32, #tpu.memory_space<smem>>
    %c43 = arith.constant 43 : index
    %43 = memref.load %arg1[%c43] : memref<61xf32, #tpu.memory_space<smem>>
    %c44 = arith.constant 44 : index
    %44 = memref.load %arg1[%c44] : memref<61xf32, #tpu.memory_space<smem>>
    %c45 = arith.constant 45 : index
    %45 = memref.load %arg1[%c45] : memref<61xf32, #tpu.memory_space<smem>>
    %c46 = arith.constant 46 : index
    %46 = memref.load %arg1[%c46] : memref<61xf32, #tpu.memory_space<smem>>
    %c47 = arith.constant 47 : index
    %47 = memref.load %arg1[%c47] : memref<61xf32, #tpu.memory_space<smem>>
    %c48 = arith.constant 48 : index
    %48 = memref.load %arg1[%c48] : memref<61xf32, #tpu.memory_space<smem>>
    %c49 = arith.constant 49 : index
    %49 = memref.load %arg1[%c49] : memref<61xf32, #tpu.memory_space<smem>>
    %c50 = arith.constant 50 : index
    %50 = memref.load %arg1[%c50] : memref<61xf32, #tpu.memory_space<smem>>
    %c51 = arith.constant 51 : index
    %51 = memref.load %arg1[%c51] : memref<61xf32, #tpu.memory_space<smem>>
    %c52 = arith.constant 52 : index
    %52 = memref.load %arg1[%c52] : memref<61xf32, #tpu.memory_space<smem>>
    %c53 = arith.constant 53 : index
    %53 = memref.load %arg1[%c53] : memref<61xf32, #tpu.memory_space<smem>>
    %c54 = arith.constant 54 : index
    %54 = memref.load %arg1[%c54] : memref<61xf32, #tpu.memory_space<smem>>
    %c55 = arith.constant 55 : index
    %55 = memref.load %arg1[%c55] : memref<61xf32, #tpu.memory_space<smem>>
    %c56 = arith.constant 56 : index
    %56 = memref.load %arg1[%c56] : memref<61xf32, #tpu.memory_space<smem>>
    %c57 = arith.constant 57 : index
    %57 = memref.load %arg1[%c57] : memref<61xf32, #tpu.memory_space<smem>>
    %c58 = arith.constant 58 : index
    %58 = memref.load %arg1[%c58] : memref<61xf32, #tpu.memory_space<smem>>
    %c59 = arith.constant 59 : index
    %59 = memref.load %arg1[%c59] : memref<61xf32, #tpu.memory_space<smem>>
    %c60 = arith.constant 60 : index
    %60 = memref.load %arg1[%c60] : memref<61xf32, #tpu.memory_space<smem>>
    %c0_0 = arith.constant 0 : index
    %c0_1 = arith.constant 0 : index
    %61 = vector.load %arg2[%c0_0, %c0_1] : memref<8x128xf32, #tpu.memory_space<vmem>>, vector<8x128xf32>
    %62 = vector.broadcast %60 : f32 to vector<8x128xf32>
    %cst = arith.constant 0.000000e+00 : f32
    %63 = vector.broadcast %cst : f32 to vector<8x128xf32>
    %cst_2 = arith.constant 0.000000e+00 : f32
    %64 = vector.broadcast %cst_2 : f32 to vector<8x128xf32>
    %cst_3 = arith.constant 0.000000e+00 : f32
    %65 = vector.broadcast %cst_3 : f32 to vector<8x128xf32>
    %66 = vector.broadcast %0 : f32 to vector<8x128xf32>
    %67 = arith.mulf %61, %66 : vector<8x128xf32>
    %68 = vector.broadcast %20 : f32 to vector<8x128xf32>
    %69 = arith.addf %67, %68 : vector<8x128xf32>
    %cst_4 = arith.constant 0.000000e+00 : f32
    %70 = vector.broadcast %cst_4 : f32 to vector<8x128xf32>
    %71 = arith.maximumf %69, %70 : vector<8x128xf32>
    %72 = vector.broadcast %40 : f32 to vector<8x128xf32>
    %73 = arith.mulf %71, %72 : vector<8x128xf32>
    %74 = arith.addf %62, %73 : vector<8x128xf32>
    %75 = vector.broadcast %1 : f32 to vector<8x128xf32>
    %76 = arith.mulf %61, %75 : vector<8x128xf32>
    %77 = vector.broadcast %21 : f32 to vector<8x128xf32>
    %78 = arith.addf %76, %77 : vector<8x128xf32>
    %cst_5 = arith.constant 0.000000e+00 : f32
    %79 = vector.broadcast %cst_5 : f32 to vector<8x128xf32>
    %80 = arith.maximumf %78, %79 : vector<8x128xf32>
    %81 = vector.broadcast %41 : f32 to vector<8x128xf32>
    %82 = arith.mulf %80, %81 : vector<8x128xf32>
    %83 = arith.addf %63, %82 : vector<8x128xf32>
    %84 = vector.broadcast %2 : f32 to vector<8x128xf32>
    %85 = arith.mulf %61, %84 : vector<8x128xf32>
    %86 = vector.broadcast %22 : f32 to vector<8x128xf32>
    %87 = arith.addf %85, %86 : vector<8x128xf32>
    %cst_6 = arith.constant 0.000000e+00 : f32
    %88 = vector.broadcast %cst_6 : f32 to vector<8x128xf32>
    %89 = arith.maximumf %87, %88 : vector<8x128xf32>
    %90 = vector.broadcast %42 : f32 to vector<8x128xf32>
    %91 = arith.mulf %89, %90 : vector<8x128xf32>
    %92 = arith.addf %64, %91 : vector<8x128xf32>
    %93 = vector.broadcast %3 : f32 to vector<8x128xf32>
    %94 = arith.mulf %61, %93 : vector<8x128xf32>
    %95 = vector.broadcast %23 : f32 to vector<8x128xf32>
    %96 = arith.addf %94, %95 : vector<8x128xf32>
    %cst_7 = arith.constant 0.000000e+00 : f32
    %97 = vector.broadcast %cst_7 : f32 to vector<8x128xf32>
    %98 = arith.maximumf %96, %97 : vector<8x128xf32>
    %99 = vector.broadcast %43 : f32 to vector<8x128xf32>
    %100 = arith.mulf %98, %99 : vector<8x128xf32>
    %101 = arith.addf %65, %100 : vector<8x128xf32>
    %102 = vector.broadcast %4 : f32 to vector<8x128xf32>
    %103 = arith.mulf %61, %102 : vector<8x128xf32>
    %104 = vector.broadcast %24 : f32 to vector<8x128xf32>
    %105 = arith.addf %103, %104 : vector<8x128xf32>
    %cst_8 = arith.constant 0.000000e+00 : f32
    %106 = vector.broadcast %cst_8 : f32 to vector<8x128xf32>
    %107 = arith.maximumf %105, %106 : vector<8x128xf32>
    %108 = vector.broadcast %44 : f32 to vector<8x128xf32>
    %109 = arith.mulf %107, %108 : vector<8x128xf32>
    %110 = arith.addf %74, %109 : vector<8x128xf32>
    %111 = vector.broadcast %5 : f32 to vector<8x128xf32>
    %112 = arith.mulf %61, %111 : vector<8x128xf32>
    %113 = vector.broadcast %25 : f32 to vector<8x128xf32>
    %114 = arith.addf %112, %113 : vector<8x128xf32>
    %cst_9 = arith.constant 0.000000e+00 : f32
    %115 = vector.broadcast %cst_9 : f32 to vector<8x128xf32>
    %116 = arith.maximumf %114, %115 : vector<8x128xf32>
    %117 = vector.broadcast %45 : f32 to vector<8x128xf32>
    %118 = arith.mulf %116, %117 : vector<8x128xf32>
    %119 = arith.addf %83, %118 : vector<8x128xf32>
    %120 = vector.broadcast %6 : f32 to vector<8x128xf32>
    %121 = arith.mulf %61, %120 : vector<8x128xf32>
    %122 = vector.broadcast %26 : f32 to vector<8x128xf32>
    %123 = arith.addf %121, %122 : vector<8x128xf32>
    %cst_10 = arith.constant 0.000000e+00 : f32
    %124 = vector.broadcast %cst_10 : f32 to vector<8x128xf32>
    %125 = arith.maximumf %123, %124 : vector<8x128xf32>
    %126 = vector.broadcast %46 : f32 to vector<8x128xf32>
    %127 = arith.mulf %125, %126 : vector<8x128xf32>
    %128 = arith.addf %92, %127 : vector<8x128xf32>
    %129 = vector.broadcast %7 : f32 to vector<8x128xf32>
    %130 = arith.mulf %61, %129 : vector<8x128xf32>
    %131 = vector.broadcast %27 : f32 to vector<8x128xf32>
    %132 = arith.addf %130, %131 : vector<8x128xf32>
    %cst_11 = arith.constant 0.000000e+00 : f32
    %133 = vector.broadcast %cst_11 : f32 to vector<8x128xf32>
    %134 = arith.maximumf %132, %133 : vector<8x128xf32>
    %135 = vector.broadcast %47 : f32 to vector<8x128xf32>
    %136 = arith.mulf %134, %135 : vector<8x128xf32>
    %137 = arith.addf %101, %136 : vector<8x128xf32>
    %138 = vector.broadcast %8 : f32 to vector<8x128xf32>
    %139 = arith.mulf %61, %138 : vector<8x128xf32>
    %140 = vector.broadcast %28 : f32 to vector<8x128xf32>
    %141 = arith.addf %139, %140 : vector<8x128xf32>
    %cst_12 = arith.constant 0.000000e+00 : f32
    %142 = vector.broadcast %cst_12 : f32 to vector<8x128xf32>
    %143 = arith.maximumf %141, %142 : vector<8x128xf32>
    %144 = vector.broadcast %48 : f32 to vector<8x128xf32>
    %145 = arith.mulf %143, %144 : vector<8x128xf32>
    %146 = arith.addf %110, %145 : vector<8x128xf32>
    %147 = vector.broadcast %9 : f32 to vector<8x128xf32>
    %148 = arith.mulf %61, %147 : vector<8x128xf32>
    %149 = vector.broadcast %29 : f32 to vector<8x128xf32>
    %150 = arith.addf %148, %149 : vector<8x128xf32>
    %cst_13 = arith.constant 0.000000e+00 : f32
    %151 = vector.broadcast %cst_13 : f32 to vector<8x128xf32>
    %152 = arith.maximumf %150, %151 : vector<8x128xf32>
    %153 = vector.broadcast %49 : f32 to vector<8x128xf32>
    %154 = arith.mulf %152, %153 : vector<8x128xf32>
    %155 = arith.addf %119, %154 : vector<8x128xf32>
    %156 = vector.broadcast %10 : f32 to vector<8x128xf32>
    %157 = arith.mulf %61, %156 : vector<8x128xf32>
    %158 = vector.broadcast %30 : f32 to vector<8x128xf32>
    %159 = arith.addf %157, %158 : vector<8x128xf32>
    %cst_14 = arith.constant 0.000000e+00 : f32
    %160 = vector.broadcast %cst_14 : f32 to vector<8x128xf32>
    %161 = arith.maximumf %159, %160 : vector<8x128xf32>
    %162 = vector.broadcast %50 : f32 to vector<8x128xf32>
    %163 = arith.mulf %161, %162 : vector<8x128xf32>
    %164 = arith.addf %128, %163 : vector<8x128xf32>
    %165 = vector.broadcast %11 : f32 to vector<8x128xf32>
    %166 = arith.mulf %61, %165 : vector<8x128xf32>
    %167 = vector.broadcast %31 : f32 to vector<8x128xf32>
    %168 = arith.addf %166, %167 : vector<8x128xf32>
    %cst_15 = arith.constant 0.000000e+00 : f32
    %169 = vector.broadcast %cst_15 : f32 to vector<8x128xf32>
    %170 = arith.maximumf %168, %169 : vector<8x128xf32>
    %171 = vector.broadcast %51 : f32 to vector<8x128xf32>
    %172 = arith.mulf %170, %171 : vector<8x128xf32>
    %173 = arith.addf %137, %172 : vector<8x128xf32>
    %174 = vector.broadcast %12 : f32 to vector<8x128xf32>
    %175 = arith.mulf %61, %174 : vector<8x128xf32>
    %176 = vector.broadcast %32 : f32 to vector<8x128xf32>
    %177 = arith.addf %175, %176 : vector<8x128xf32>
    %cst_16 = arith.constant 0.000000e+00 : f32
    %178 = vector.broadcast %cst_16 : f32 to vector<8x128xf32>
    %179 = arith.maximumf %177, %178 : vector<8x128xf32>
    %180 = vector.broadcast %52 : f32 to vector<8x128xf32>
    %181 = arith.mulf %179, %180 : vector<8x128xf32>
    %182 = arith.addf %146, %181 : vector<8x128xf32>
    %183 = vector.broadcast %13 : f32 to vector<8x128xf32>
    %184 = arith.mulf %61, %183 : vector<8x128xf32>
    %185 = vector.broadcast %33 : f32 to vector<8x128xf32>
    %186 = arith.addf %184, %185 : vector<8x128xf32>
    %cst_17 = arith.constant 0.000000e+00 : f32
    %187 = vector.broadcast %cst_17 : f32 to vector<8x128xf32>
    %188 = arith.maximumf %186, %187 : vector<8x128xf32>
    %189 = vector.broadcast %53 : f32 to vector<8x128xf32>
    %190 = arith.mulf %188, %189 : vector<8x128xf32>
    %191 = arith.addf %155, %190 : vector<8x128xf32>
    %192 = vector.broadcast %14 : f32 to vector<8x128xf32>
    %193 = arith.mulf %61, %192 : vector<8x128xf32>
    %194 = vector.broadcast %34 : f32 to vector<8x128xf32>
    %195 = arith.addf %193, %194 : vector<8x128xf32>
    %cst_18 = arith.constant 0.000000e+00 : f32
    %196 = vector.broadcast %cst_18 : f32 to vector<8x128xf32>
    %197 = arith.maximumf %195, %196 : vector<8x128xf32>
    %198 = vector.broadcast %54 : f32 to vector<8x128xf32>
    %199 = arith.mulf %197, %198 : vector<8x128xf32>
    %200 = arith.addf %164, %199 : vector<8x128xf32>
    %201 = vector.broadcast %15 : f32 to vector<8x128xf32>
    %202 = arith.mulf %61, %201 : vector<8x128xf32>
    %203 = vector.broadcast %35 : f32 to vector<8x128xf32>
    %204 = arith.addf %202, %203 : vector<8x128xf32>
    %cst_19 = arith.constant 0.000000e+00 : f32
    %205 = vector.broadcast %cst_19 : f32 to vector<8x128xf32>
    %206 = arith.maximumf %204, %205 : vector<8x128xf32>
    %207 = vector.broadcast %55 : f32 to vector<8x128xf32>
    %208 = arith.mulf %206, %207 : vector<8x128xf32>
    %209 = arith.addf %173, %208 : vector<8x128xf32>
    %210 = vector.broadcast %16 : f32 to vector<8x128xf32>
    %211 = arith.mulf %61, %210 : vector<8x128xf32>
    %212 = vector.broadcast %36 : f32 to vector<8x128xf32>
    %213 = arith.addf %211, %212 : vector<8x128xf32>
    %cst_20 = arith.constant 0.000000e+00 : f32
    %214 = vector.broadcast %cst_20 : f32 to vector<8x128xf32>
    %215 = arith.maximumf %213, %214 : vector<8x128xf32>
    %216 = vector.broadcast %56 : f32 to vector<8x128xf32>
    %217 = arith.mulf %215, %216 : vector<8x128xf32>
    %218 = arith.addf %182, %217 : vector<8x128xf32>
    %219 = vector.broadcast %17 : f32 to vector<8x128xf32>
    %220 = arith.mulf %61, %219 : vector<8x128xf32>
    %221 = vector.broadcast %37 : f32 to vector<8x128xf32>
    %222 = arith.addf %220, %221 : vector<8x128xf32>
    %cst_21 = arith.constant 0.000000e+00 : f32
    %223 = vector.broadcast %cst_21 : f32 to vector<8x128xf32>
    %224 = arith.maximumf %222, %223 : vector<8x128xf32>
    %225 = vector.broadcast %57 : f32 to vector<8x128xf32>
    %226 = arith.mulf %224, %225 : vector<8x128xf32>
    %227 = arith.addf %191, %226 : vector<8x128xf32>
    %228 = vector.broadcast %18 : f32 to vector<8x128xf32>
    %229 = arith.mulf %61, %228 : vector<8x128xf32>
    %230 = vector.broadcast %38 : f32 to vector<8x128xf32>
    %231 = arith.addf %229, %230 : vector<8x128xf32>
    %cst_22 = arith.constant 0.000000e+00 : f32
    %232 = vector.broadcast %cst_22 : f32 to vector<8x128xf32>
    %233 = arith.maximumf %231, %232 : vector<8x128xf32>
    %234 = vector.broadcast %58 : f32 to vector<8x128xf32>
    %235 = arith.mulf %233, %234 : vector<8x128xf32>
    %236 = arith.addf %200, %235 : vector<8x128xf32>
    %237 = vector.broadcast %19 : f32 to vector<8x128xf32>
    %238 = arith.mulf %61, %237 : vector<8x128xf32>
    %239 = vector.broadcast %39 : f32 to vector<8x128xf32>
    %240 = arith.addf %238, %239 : vector<8x128xf32>
    %cst_23 = arith.constant 0.000000e+00 : f32
    %241 = vector.broadcast %cst_23 : f32 to vector<8x128xf32>
    %242 = arith.maximumf %240, %241 : vector<8x128xf32>
    %243 = vector.broadcast %59 : f32 to vector<8x128xf32>
    %244 = arith.mulf %242, %243 : vector<8x128xf32>
    %245 = arith.addf %209, %244 : vector<8x128xf32>
    %246 = arith.addf %218, %227 : vector<8x128xf32>
    %247 = arith.addf %236, %245 : vector<8x128xf32>
    %248 = arith.addf %246, %247 : vector<8x128xf32>
    %c0_24 = arith.constant 0 : index
    %c0_25 = arith.constant 0 : index
    %249 = vector.load %arg3[%c0_24, %c0_25] : memref<8x128xf32, #tpu.memory_space<vmem>>, vector<8x128xf32>
    tpu.vector_store %arg3[%c0_24, %c0_25], %248 {strides = array<i32>} : memref<8x128xf32, #tpu.memory_space<vmem>>, vector<8x128xf32>,
    return
  }
  func.func @transform_0(%arg0: i32) -> i32 {
    %c0_i32 = arith.constant 0 : i32
    %c0_i32_0 = arith.constant 0 : i32
    return %c0_i32 : i32
  }
  func.func @transform_1(%arg0: i32) -> (i32, i32) {
    %c0_i32 = arith.constant 0 : i32
    %c0_i32_0 = arith.constant 0 : i32
    return %arg0, %c0_i32 : i32, i32
  }
  func.func @transform_2(%arg0: i32) -> (i32, i32) {
    %c0_i32 = arith.constant 0 : i32
    %c0_i32_0 = arith.constant 0 : i32
    return %arg0, %c0_i32 : i32, i32
  }
}

</mosaic_0001>

<bundles_post_ra>
// kernel: tpu_custom_call.1
= control target key start
LH: loop header
LB: loop body
LE: loop exit
PB: predicated region body
PF: predicated region fallthrough
CT: control target
= control target key end

     0   :  { %s646_s0 = inlined_call_operand.hbm [shape: f32[61], index: 0, kind: input, shape index: {}]   ;;  %s647_s1 = inlined_call_operand.hbm [shape: f32[8,128], index: 1, kind: input, shape index: {}]   ;;  %s648_s2 = inlined_call_operand.hbm [shape: f32[8,128], index: 2, kind: output, shape index: {}]  }
   0x1   :  { %649 = sst [smem:[#allocation14_spill]] %s648_s2 }
   0x2   :  { %7 = vsyncpa [#allocation5], 0 }
   0x3   :  { %8 = vsyncpa [#allocation3], 0 }
   0x4   :  { %9 = vsyncpa [#allocation4], 0  ;;  %s395_s9 = smov [#allocation2]   ;;  %s396_s12 = smov [#allocation6]  }
   0x5   :  { %17 = dma.hbm_to_smem %s646_s0, 16, %s395_s9, [#allocation5]  }
   0x6   :  { %s24_s13 = sshll.u32 %s396_s12, 4  ;;  %s25_s13 = int_to_ptr.vmem [resolvable:$true] %s24_s13 }
   0x7   :  { %s357_s14 = scalar_lea.vmem %s25_s13, 128  ;;  %p362_p1 = scmp.lt.s32.totalorder %s25_s13, %s25_s13 }
   0x8   :  { %p358_p0 = scmp.ne.s32.totalorder %s25_s13, %s357_s14  ;;  %p363_p2 = scmp.lt.s32.totalorder %s357_s14, %s357_s14 }
   0xa   :  { %p364_p3 = por %p363_p2, %p362_p1 }
   0xc   :  { %p365_p4 = pnand %p364_p3, %p358_p0 }
   0xe   :  { %368 = shalt.err (!%p365_p4)
}
   0xf   :  { %27 = dma.hbm_to_vmem [thread:$0]  %s647_s1, 128, %s25_s13, [#allocation3]  }
  0x10   :  { %389 = dma.done.wait [#allocation5], 16  }
  0x11   :  { %390 = vsyncadd [#allocation5], 4294967280 }
  0x12   :  { %391 = dma.done.wait [#allocation3], 128  }
  0x13   :  { %392 = vsyncadd [#allocation3], 4294967168 }
  0x14   :  { %34 = sfence }
  0x15   :  { %s419_s0 = sld [smem:[#allocation2]]  ;;  %v96_v0 = vld [vmem:[#allocation6] sm:$0xff] }
  0x16   :  { %s421_s17 = sld [smem:[#allocation2 + $0x1]] }
  0x17   :  { %s423_s18 = sld [smem:[#allocation2 + $0x2]] }
  0x18   :  { %s425_s19 = sld [smem:[#allocation2 + $0x3]] }
  0x19   :  { %s427_s20 = sld [smem:[#allocation2 + $0x4]] }
  0x1a   :  { %s429_s21 = sld [smem:[#allocation2 + $0x5]] }
  0x1b   :  { %s431_s22 = sld [smem:[#allocation2 + $0x6]]  ;;  %v98_v1 = vstv %s419_s0 }
  0x1c   :  { %s433_s1 = sld [smem:[#allocation2 + $0x7]]  ;;  %v106_v2 = vstv %s421_s17  ;;  %v99_v7 = vmul.f32 %v98_v1, %v96_v0 }
  0x1d   :  { %s435_s23 = sld [smem:[#allocation2 + $0x8]]  ;;  %v114_v3 = vstv %s423_s18  ;;  %v107_v8 = vmul.f32 %v106_v2, %v96_v0 }
  0x1e   :  { %s437_s24 = sld [smem:[#allocation2 + $0x9]]  ;;  %v122_v4 = vstv %s425_s19  ;;  %v115_v11 = vmul.f32 %v114_v3, %v96_v0 }
  0x1f   :  { %s439_s25 = sld [smem:[#allocation2 + $0xa]]  ;;  %v130_v5 = vstv %s427_s20  ;;  %v123_v12 = vmul.f32 %v122_v4, %v96_v0 }
  0x20   :  { %s441_s26 = sld [smem:[#allocation2 + $0xb]]  ;;  %v138_v6 = vstv %s429_s21  ;;  %v131_v15 = vmul.f32 %v130_v5, %v96_v0 }
  0x21   :  { %s443_s27 = sld [smem:[#allocation2 + $0xc]]  ;;  %v146_v9 = vstv %s431_s22  ;;  %v139_v16 = vmul.f32 %v138_v6, %v96_v0 }
  0x22   :  { %s445_s28 = sld [smem:[#allocation2 + $0xd]]  ;;  %v154_v10 = vstv %s433_s1  ;;  %v147_v19 = vmul.f32 %v146_v9, %v96_v0 }
  0x23   :  { %s447_s29 = sld [smem:[#allocation2 + $0xe]]  ;;  %v162_v13 = vstv %s435_s23  ;;  %v155_v20 = vmul.f32 %v154_v10, %v96_v0 }
  0x24   :  { %s449_s30 = sld [smem:[#allocation2 + $0xf]]  ;;  %v170_v14 = vstv %s437_s24  ;;  %v163_v23 = vmul.f32 %v162_v13, %v96_v0 }
  0x25   :  { %s451_s3 = sld [smem:[#allocation2 + $0x10]]  ;;  %v178_v17 = vstv %s439_s25  ;;  %v171_v24 = vmul.f32 %v170_v14, %v96_v0 }
  0x26   :  { %s453_s4 = sld [smem:[#allocation2 + $0x11]]  ;;  %v186_v18 = vstv %s441_s26  ;;  %v179_v27 = vmul.f32 %v178_v17, %v96_v0 }
  0x27   :  { %s455_s5 = sld [smem:[#allocation2 + $0x12]]  ;;  %v194_v21 = vstv %s443_s27  ;;  %v187_v28 = vmul.f32 %v186_v18, %v96_v0 }
  0x28   :  { %s457_s6 = sld [smem:[#allocation2 + $0x13]]  ;;  %v202_v22 = vstv %s445_s28  ;;  %v195_v31 = vmul.f32 %v194_v21, %v96_v0 }
  0x29   :  { %s459_s7 = sld [smem:[#allocation2 + $0x14]]  ;;  %v210_v25 = vstv %s447_s29  ;;  %v203_v32 = vmul.f32 %v202_v22, %v96_v0 }
  0x2a   :  { %s461_s8 = sld [smem:[#allocation2 + $0x15]]  ;;  %v218_v26 = vstv %s449_s30  ;;  %v211_v37 = vmul.f32 %v210_v25, %v96_v0 }
  0x2b   :  { %s463_s9 = sld [smem:[#allocation2 + $0x16]]  ;;  %v226_v29 = vstv %s451_s3  ;;  %v523_v38 = vmul.f32 %v218_v26, %v96_v0 }
  0x2c   :  { %s465_s10 = sld [smem:[#allocation2 + $0x17]]  ;;  %v234_v30 = vstv %s453_s4  ;;  %v529_v41 = vmul.f32 %v226_v29, %v96_v0 }
  0x2d   :  { %s467_s11 = sld [smem:[#allocation2 + $0x18]]  ;;  %v242_v33 = vstv %s455_s5  ;;  %v531_v42 = vmul.f32 %v234_v30, %v96_v0 }
  0x2e   :  { %s469_s12 = sld [smem:[#allocation2 + $0x19]]  ;;  %v250_v34 = vstv %s457_s6  ;;  %v537_v45 = vmul.f32 %v242_v33, %v96_v0 }
  0x2f   :  { %s471_s13 = sld [smem:[#allocation2 + $0x1a]]  ;;  %v100_v35 = vstv %s459_s7  ;;  %v539_v46 = vmul.f32 %v250_v34, %v96_v0 }
  0x30   :  { %s473_s14 = sld [smem:[#allocation2 + $0x1b]]  ;;  %v108_v36 = vstv %s461_s8  ;;  %v543_v47 = vadd.f32 %v100_v35, %v99_v7 }
  0x31   :  { %s475_s15 = sld [smem:[#allocation2 + $0x1c]]  ;;  %v116_v39 = vstv %s463_s9  ;;  %v545_v48 = vadd.f32 %v108_v36, %v107_v8 }
  0x32   :  { %s477_s16 = sld [smem:[#allocation2 + $0x1d]]  ;;  %v124_v40 = vstv %s465_s10  ;;  %v117_v51 = vadd.f32 %v116_v39, %v115_v11  ;;  %v102_v63 = vmax.f32 %v543_v47, 0.0 }
  0x33   :  { %650 = sst [smem:[#allocation11_spill]] %s467_s11  ;;  %v125_v52 = vadd.f32 %v124_v40, %v123_v12  ;;  %v110_v0 = vmax.f32 %v545_v48, 0.0 }
  0x34   :  { %s479_s2 = sld [smem:[#allocation2 + $0x1e]]  ;;  %v140_v44 = vstv %s469_s12  ;;  %v118_v3 = vmax.f32 %v117_v51, 0.0 }
  0x35   :  { %651 = sst [smem:[#allocation12_spill]] %s471_s13  ;;  %v141_v56 = vadd.f32 %v140_v44, %v139_v16  ;;  %v126_v7 = vmax.f32 %v125_v52, 0.0 }
  0x36   :  { %s483_s11 = sld [smem:[#allocation2 + $0x1f]]  ;;  %v156_v50 = vstv %s473_s14 }
  0x37   :  { %652 = sst [smem:[#allocation13_spill]] %s475_s15  ;;  %v157_v60 = vadd.f32 %v156_v50, %v155_v20  ;;  %v142_v11 = vmax.f32 %v141_v56, 0.0 }
  0x38   :  { %s487_s13 = sld [smem:[#allocation2 + $0x20]]  ;;  %v172_v54 = vstv %s477_s16  ;;  %s397_s16 = smov [#allocation7]  }
  0x39   :  { %s491_s15 = sld [smem:[#allocation2 + $0x21]]  ;;  %v569_v2 = vadd.f32 %v172_v54, %v171_v24  ;;  %v158_v13 = vmax.f32 %v157_v60, 0.0 }
  0x3a   :  { %s495_s0 = sld [smem:[#allocation2 + $0x22]]  ;;  %v180_v57 = vstv %s479_s2 }
  0x3b   :  { %s499_s17 = sld [smem:[#allocation2 + $0x23]]  ;;  %v181_v4 = vadd.f32 %v180_v57, %v179_v27  ;;  %v174_v17 = vmax.f32 %v569_v2, 0.0 }
  0x3c   :  { %s503_s18 = sld [smem:[#allocation2 + $0x24]]  ;;  %v188_v58 = vstv %s483_s11 }
  0x3d   :  { %s507_s19 = sld [smem:[#allocation2 + $0x25]]  ;;  %v189_v5 = vadd.f32 %v188_v58, %v187_v28  ;;  %v182_v21 = vmax.f32 %v181_v4, 0.0 }
  0x3e   :  { %s511_s20 = sld [smem:[#allocation2 + $0x26]]  ;;  %v196_v61 = vstv %s487_s13 }
  0x3f   :  { %s515_s21 = sld [smem:[#allocation2 + $0x27]]  ;;  %v204_v62 = vstv %s491_s15  ;;  %v577_v9 = vadd.f32 %v196_v61, %v195_v31  ;;  %v190_v22 = vmax.f32 %v189_v5, 0.0 }
  0x40   :  { %s653_s22 = sld [smem:[#allocation11_spill]]  ;;  %v212_v6 = vstv %s495_s0  ;;  %v579_v10 = vadd.f32 %v204_v62, %v203_v32  ;;  %s268_s0 = sshll.u32 %s397_s16, 4  ;;  %s269_s0 = int_to_ptr.vmem [resolvable:$true] %s268_s0 }
  0x41   :  { %s519_s1 = sld [smem:[#allocation2 + $0x28]]  ;;  %v220_v14 = vstv %s499_s17  ;;  %v213_v18 = vadd.f32 %v212_v6, %v211_v37  ;;  %v198_v24 = vmax.f32 %v577_v9, 0.0  ;;  %s369_s17 = scalar_lea.vmem %s269_s0, 128 }
  0x42   :  { %s654_s23 = sld [smem:[#allocation12_spill]]  ;;  %v206_v25 = vmax.f32 %v579_v10, 0.0  ;;  %v221_v26 = vadd.f32 %v220_v14, %v523_v38  ;;  %v228_v34 = vstv %s503_s18  ;;  %p370_p5 = scmp.ne.s32.totalorder %s269_s0, %s369_s17 }
  0x43   :  { %s525_s24 = sld [smem:[#allocation2 + $0x29]]  ;;  %v214_v33 = vmax.f32 %v213_v18, 0.0  ;;  %v236_v36 = vstv %s507_s19  ;;  %p374_p6 = scmp.lt.s32.totalorder %s269_s0, %s269_s0 }
  0x44   :  { %s655_s25 = sld [smem:[#allocation13_spill]]  ;;  %v244_v37 = vstv %s511_s20  ;;  %v222_v51 = vmax.f32 %v221_v26, 0.0  ;;  %v237_v60 = vadd.f32 %v236_v36, %v531_v42  ;;  %p375_p7 = scmp.lt.s32.totalorder %s369_s17, %s369_s17 }
  0x45   :  { %s533_s26 = sld [smem:[#allocation2 + $0x2a]]  ;;  %v252_v38 = vstv %s515_s21  ;;  %v245_v54 = vadd.f32 %v244_v37, %v537_v45 }
  0x46   :  { %v132_v43 = vstv %s653_s22  ;;  %s541_s27 = sld [smem:[#allocation2 + $0x2b]]  ;;  %v253_v56 = vadd.f32 %v252_v38, %v539_v46  ;;  %p376_p8 = por %p375_p7, %p374_p6 }
  0x47   :  { %s549_s28 = sld [smem:[#allocation2 + $0x2c]]  ;;  %v555_v55 = vadd.f32 %v132_v43, %v131_v15  ;;  %v103_v39 = vstv %s519_s1 }
  0x48   :  { %v148_v49 = vstv %s654_s23  ;;  %s553_s29 = sld [smem:[#allocation2 + $0x2d]]  ;;  %v104_v57 = vmul.f32 %v103_v39, %v102_v63  ;;  %v246_v63 = vmax.f32 %v245_v54, 0.0  ;;  %v254_v6 = vmax.f32 %v253_v56, 0.0  ;;  %p377_p9 = pnand %p376_p8, %p370_p5 }
  0x49   :  { %s559_s30 = sld [smem:[#allocation2 + $0x2e]]  ;;  %v149_v59 = vadd.f32 %v148_v49, %v147_v19  ;;  %v134_v8 = vmax.f32 %v555_v55, 0.0  ;;  %v111_v27 = vstv %s525_s24 }
  0x4a   :  { %v164_v53 = vstv %s655_s25  ;;  %s563_s3 = sld [smem:[#allocation2 + $0x2f]]  ;;  %v112_v40 = vmul.f32 %v111_v27, %v110_v0 }
  0x4b   :  { %v567_v1 = vadd.f32 %v164_v53, %v163_v23  ;;  %s571_s2 = sld [smem:[#allocation2 + $0x30]]  ;;  %v150_v12 = vmax.f32 %v149_v59, 0.0  ;;  %v119_v15 = vstv %s533_s26  ;;  %v229_v59 = vadd.f32 %v228_v34, %v529_v41 }
  0x4c   :  { %s574_s4 = sld [smem:[#allocation2 + $0x31]]  ;;  %v127_v19 = vstv %s541_s27  ;;  %v120_v28 = vmul.f32 %v119_v15, %v118_v3 }
  0x4d   :  { %s581_s5 = sld [smem:[#allocation2 + $0x32]]  ;;  %v166_v16 = vmax.f32 %v567_v1, 0.0  ;;  %v128_v31 = vmul.f32 %v127_v19, %v126_v7  ;;  %v135_v61 = vstv %s549_s28  ;;  %v230_v42 = vmax.f32 %v229_v59, 0.0 }
  0x4e   :  { %s584_s6 = sld [smem:[#allocation2 + $0x33]]  ;;  %v143_v29 = vstv %s553_s29  ;;  %v136_v41 = vmul.f32 %v135_v61, %v134_v8  ;;  %v238_v7 = vmax.f32 %v237_v60, 0.0 }
  0x4f   :  { %s589_s7 = sld [smem:[#allocation2 + $0x34]]  ;;  %v151_v20 = vstv %s559_s30  ;;  %v144_v43 = vmul.f32 %v143_v29, %v142_v11 }
  0x50   :  { %s593_s8 = sld [smem:[#allocation2 + $0x35]]  ;;  %v159_v23 = vstv %s563_s3  ;;  %v152_v30 = vmul.f32 %v151_v20, %v150_v12 }
  0x51   :  { %s599_s9 = sld [smem:[#allocation2 + $0x36]]  ;;  %v160_v32 = vmul.f32 %v159_v23, %v158_v13  ;;  %v145_v62 = vadd.f32 %v144_v43, %v112_v40  ;;  %v167_v3 = vstv %s571_s2 }
  0x52   :  { %s603_s10 = sld [smem:[#allocation2 + $0x37]]  ;;  %v153_v48 = vadd.f32 %v152_v30, %v120_v28  ;;  %v175_v49 = vstv %s574_s4  ;;  %v168_v11 = vmul.f32 %v167_v3, %v166_v16 }
  0x53   :  { %s606_s11 = sld [smem:[#allocation2 + $0x38]]  ;;  %v183_v35 = vstv %s581_s5  ;;  %v161_v52 = vadd.f32 %v160_v32, %v128_v31  ;;  %v176_v0 = vmul.f32 %v175_v49, %v174_v17 }
  0x54   :  { %s612_s12 = sld [smem:[#allocation2 + $0x39]]  ;;  %v191_v44 = vstv %s584_s6  ;;  %v184_v50 = vmul.f32 %v183_v35, %v182_v21 }
  0x55   :  { %s616_s13 = sld [smem:[#allocation2 + $0x3a]]  ;;  %v192_v53 = vmul.f32 %v191_v44, %v190_v22  ;;  %v177_v12 = vadd.f32 %v176_v0, %v145_v62  ;;  %v199_v17 = vstv %s589_s7 }
  0x56   :  { %s619_s14 = sld [smem:[#allocation2 + $0x3b]]  ;;  %v185_v4 = vadd.f32 %v184_v50, %v153_v48  ;;  %v207_v45 = vstv %s593_s8  ;;  %v200_v26 = vmul.f32 %v199_v17, %v198_v24 }
  0x57   :  { %s337_s15 = sld [smem:[#allocation2 + $0x3c]]  ;;  %v215_v58 = vstv %s599_s9  ;;  %v193_v5 = vadd.f32 %v192_v53, %v161_v52  ;;  %v208_v13 = vmul.f32 %v207_v45, %v206_v25 }
  0x58   :  { %v223_v2 = vstv %s603_s10  ;;  %v216_v46 = vmul.f32 %v215_v58, %v214_v33 }
  0x59   :  { %v224_v47 = vmul.f32 %v223_v2, %v222_v51  ;;  %v231_v55 = vstv %s606_s11  ;;  %v209_v27 = vadd.f32 %v208_v13, %v177_v12 }
  0x5a   :  { %v217_v18 = vadd.f32 %v216_v46, %v185_v4  ;;  %v239_v19 = vstv %s612_s12  ;;  %v232_v16 = vmul.f32 %v231_v55, %v230_v42 }
  0x5b   :  { %v247_v10 = vstv %s616_s13  ;;  %v225_v21 = vadd.f32 %v224_v47, %v193_v5  ;;  %v240_v28 = vmul.f32 %v239_v19, %v238_v7 }
  0x5c   :  { %v255_v14 = vstv %s619_s14  ;;  %v248_v22 = vmul.f32 %v247_v10, %v246_v63 }
  0x5d   :  { %v97_v15 = vstv %s337_s15  ;;  %v256_v23 = vmul.f32 %v255_v14, %v254_v6  ;;  %v241_v31 = vadd.f32 %v240_v28, %v209_v27 }
  0x5e   :  { %v105_v20 = vadd.f32 %v104_v57, %v97_v15  ;;  %v249_v29 = vadd.f32 %v248_v22, %v217_v18 }
  0x5f   :  { %v257_v25 = vadd.f32 %v256_v23, %v225_v21 }
  0x60   :  { %v137_v8 = vadd.f32 %v136_v41, %v105_v20 }
  0x61   :  { %v259_v33 = vadd.f32 %v257_v25, %v249_v29 }
  0x62   :  { %v169_v1 = vadd.f32 %v168_v11, %v137_v8 }
  0x64   :  { %v201_v30 = vadd.f32 %v200_v26, %v169_v1 }
  0x66   :  { %v233_v32 = vadd.f32 %v232_v16, %v201_v30 }
  0x68   :  { %v258_v34 = vadd.f32 %v241_v31, %v233_v32 }
  0x6a   :  { %v260_v35 = vadd.f32 %v259_v33, %v258_v34 }
  0x6c   :  { %261 = vst [vmem:[#allocation7] sm:$0xff] %v260_v35 }
  0x6d   :  { %380 = shalt.err (!%p377_p9)
}
  0x6e   :  { %s656_s20 = sld [smem:[#allocation14_spill]] }
  0x74   :  { %271 = dma.vmem_to_hbm [thread:$0]  %s269_s0, 128, %s656_s20, [#allocation4]  }
  0x75   :  { %393 = dma.done.wait [#allocation4], 128  }
  0x76   :  { %394 = vsyncadd [#allocation4], 4294967168 }
  0x77   :  { %275 = vsyncpa [#allocation3], 1 }
  0x78   :  { %276 = vsyncpa [#allocation4], 1 }
  0x79   :  { %277 = vsyncpa [#allocation5], 1 }

</bundles_post_ra>
